<compile_context>
chip_gen: v7x
topology: tpu7x:2x2x1
jax: 0.10.0
libtpu: 0.0.40
codegen_flags: <defaults>
</compile_context>

<pallas_src>
import math

import jax
import jax.numpy as jnp
from jax.experimental import pallas as pl
from jax.experimental.pallas import tpu as pltpu


# ----------------------------------------------------------------------------
# VMEM budget (per TPU generation) and tile picking
# ----------------------------------------------------------------------------

_VMEM_LIMIT_CACHE = None


def _vmem_limit():
    """100 MiB on 128 MiB parts (v5e/v6e), 48 MiB on 64 MiB parts (v7x)."""
    global _VMEM_LIMIT_CACHE
    if _VMEM_LIMIT_CACHE is None:
        limit = 48 * 1024 * 1024
        try:
            cap = int(pltpu.get_tpu_info().vmem_capacity_bytes)
            if cap >= 128 * 1024 * 1024:
                limit = 100 * 1024 * 1024
        except Exception:
            pass
        _VMEM_LIMIT_CACHE = limit
    return _VMEM_LIMIT_CACHE


def _pick_tile(dim, candidates):
    """Largest candidate that evenly divides `dim`, else the full dim."""
    for c in candidates:
        if c <= dim and dim % c == 0:
            return c
    return dim
    # TODO(synk): non-divisible dims fall back to a single un-pipelined block;
    #             a cdiv grid + in-kernel masking would be more robust.


# ----------------------------------------------------------------------------
# Tiled linear:  y = x @ w_t + b   (w_t already transposed, bf16)
# ----------------------------------------------------------------------------

def _linear_kernel(x_ref, w_ref, b_ref, o_ref, acc_ref):
    k = pl.program_id(2)

    @pl.when(k == 0)
    def _init():
        acc_ref[...] = jnp.zeros_like(acc_ref)

    # Cast the activation tile in-kernel (no standalone XLA cast pass in HBM).
    acc_ref[...] += jnp.dot(x_ref[...].astype(jnp.bfloat16), w_ref[...],
                            preferred_element_type=jnp.float32)

    @pl.when(k == pl.num_programs(2) - 1)
    def _finalize():
        o_ref[...] = (acc_ref[...] + b_ref[...]).astype(o_ref.dtype)


def pallas_linear(x, w_t, b, out_dtype):
    """x: (M, Din) f32/bf16; w_t: (Din, Dout) bf16; b: (1, Dout) f32."""
    M, Din = x.shape
    Dout = w_t.shape[1]
    tm = _pick_tile(M, (1024, 512, 256, 128, 64, 32, 16, 8))
    tn = _pick_tile(Dout, (512, 256, 128))
    tk = _pick_tile(Din, (1024, 512, 256, 128))
    grid = (M // tm, Dout // tn, Din // tk)

    return pl.pallas_call(
        _linear_kernel,
        out_shape=jax.ShapeDtypeStruct((M, Dout), out_dtype),
        grid_spec=pltpu.PrefetchScalarGridSpec(
            num_scalar_prefetch=0,
            grid=grid,
            in_specs=[
                pl.BlockSpec((tm, tk), lambda i, j, k: (i, k)),
                pl.BlockSpec((tk, tn), lambda i, j, k: (k, j)),
                pl.BlockSpec((1, tn), lambda i, j, k: (0, j)),
            ],
            out_specs=pl.BlockSpec((tm, tn), lambda i, j, k: (i, j)),
            scratch_shapes=[pltpu.VMEM((tm, tn), jnp.float32)],
        ),
        compiler_params=pltpu.CompilerParams(
            dimension_semantics=("parallel", "parallel", "arbitrary"),
            vmem_limit_bytes=_vmem_limit(),
        ),
    )(x, w_t, b)


# ----------------------------------------------------------------------------
# Flash-style attention (KV axis as inner "arbitrary" grid dim)
# ----------------------------------------------------------------------------

def _flash_body(q, k, v, keep, o_ref, m_sc, l_sc, acc_sc):
    ki = pl.program_id(2)

    @pl.when(ki == 0)
    def _init():
        m_sc[...] = jnp.full_like(m_sc, -jnp.inf)
        l_sc[...] = jnp.zeros_like(l_sc)
        acc_sc[...] = jnp.zeros_like(acc_sc)

    # Q is pre-scaled by 1/sqrt(d_k) (folded into the Q projection weights).
    # Contract last dims of q and k directly on the MXU (no k.T relayout).
    s = jax.lax.dot_general(q, k, (((1,), (1,)), ((), ())),
                            preferred_element_type=jnp.float32)   # (tq, tkv)
    if keep is not None:
        s = jnp.where(keep, s, jnp.float32(-1e9))   # keep broadcasts over rows

    m_prev = m_sc[...]
    m_new = jnp.maximum(m_prev, jnp.max(s, axis=-1, keepdims=True))
    alpha = jnp.exp(m_prev - m_new)
    p = jnp.exp(s - m_new)
    l_sc[...] = alpha * l_sc[...] + jnp.sum(p, axis=-1, keepdims=True)
    acc_sc[...] = alpha * acc_sc[...] + jnp.dot(
        p.astype(v.dtype), v, preferred_element_type=jnp.float32)
    m_sc[...] = m_new

    @pl.when(ki == pl.num_programs(2) - 1)
    def _finalize():
        inv_l = pl.reciprocal(l_sc[...], approx=True)
        o_ref[0] = (acc_sc[...] * inv_l).astype(o_ref.dtype)


def _flash_kernel(q_ref, k_ref, v_ref, o_ref, m_sc, l_sc, acc_sc):
    _flash_body(q_ref[0], k_ref[0], v_ref[0], None, o_ref, m_sc, l_sc, acc_sc)


def _flash_kernel_masked(q_ref, k_ref, v_ref, mask_ref, o_ref,
                         m_sc, l_sc, acc_sc):
    # mask_ref[0] is (1, tkv) for key-padding masks or (tq, tkv) for full
    # masks; both broadcast cleanly against the (tq, tkv) score block.
    _flash_body(q_ref[0], k_ref[0], v_ref[0], mask_ref[0] != 0,
                o_ref, m_sc, l_sc, acc_sc)


def pallas_flash_attention(q, k, v, mask, mask_kind, num_heads):
    """q: (B*H, Sq, d_k); k/v: (B*H, Skv, d_k) bf16 (Q pre-scaled).
    mask: None | (B,1,Skv) int8 ("key") | (B,Sq,Skv) int8 ("full")."""
    BH, Sq, dk = q.shape
    Skv = k.shape[1]
    tq = _pick_tile(Sq, (512, 256, 128, 64, 32, 16, 8))
    tkv = _pick_tile(Skv, (512, 256, 128))
    grid = (BH, Sq // tq, Skv // tkv)

    qo_spec = pl.BlockSpec((1, tq, dk), lambda b, qi, ki: (b, qi, 0))
    kv_spec = pl.BlockSpec((1, tkv, dk), lambda b, qi, ki: (b, ki, 0))
    scratch = [
        pltpu.VMEM((tq, 1), jnp.float32),   # running max
        pltpu.VMEM((tq, 1), jnp.float32),   # running sum
        pltpu.VMEM((tq, dk), jnp.float32),  # accumulator
    ]

    in_specs = [qo_spec, kv_spec, kv_spec]
    args = [q, k, v]
    if mask is None:
        kernel = _flash_kernel
    else:
        h = num_heads
        if mask_kind == "key":
            # (B,1,Skv) int8 key-padding mask: (1,1,tkv) block, broadcast
            # across the tq query rows inside the kernel (no S^2 tensor).
            in_specs.append(
                pl.BlockSpec((1, 1, tkv), lambda b, qi, ki: (b // h, 0, ki)))
        else:
            # (B,Sq,Skv) int8 mask; heads share it via b // h (no per-head copy).
            in_specs.append(
                pl.BlockSpec((1, tq, tkv), lambda b, qi, ki: (b // h, qi, ki)))
        args.append(mask)
        kernel = _flash_kernel_masked

    return pl.pallas_call(
        kernel,
        out_shape=jax.ShapeDtypeStruct((BH, Sq, dk), jnp.bfloat16),
        grid_spec=pltpu.PrefetchScalarGridSpec(
            num_scalar_prefetch=0,
            grid=grid,
            in_specs=in_specs,
            out_specs=qo_spec,
            scratch_shapes=scratch,
        ),
        compiler_params=pltpu.CompilerParams(
            dimension_semantics=("parallel", "parallel", "arbitrary"),
            vmem_limit_bytes=_vmem_limit(),
        ),
    )(*args)


# ----------------------------------------------------------------------------
# Output projection fused with the head merge:
#   out[b, s, :] = sum_h attn[b*H+h, s, :] @ w_o[h] + b_o
# Consumes the flash output directly in (B*H, S, d_k) layout — no transpose.
# ----------------------------------------------------------------------------

def _out_proj_kernel(x_ref, w_ref, b_ref, o_ref):
    # x_ref: (h, tm, d_k) bf16; w_ref: (h, d_k, tn) bf16; b_ref: (1, tn) f32
    h = x_ref.shape[0]
    acc = jnp.dot(x_ref[0], w_ref[0], preferred_element_type=jnp.float32)
    for i in range(1, h):
        acc = acc + jnp.dot(x_ref[i], w_ref[i],
                            preferred_element_type=jnp.float32)
    o_ref[0] = (acc + b_ref[...]).astype(o_ref.dtype)


def pallas_out_projection(x, w_hdD, b, batch, out_dtype):
    """x: (B*H, S, d_k) bf16; w_hdD: (H, d_k, D) bf16; b: (1, D) f32."""
    BH, S, dk = x.shape
    h = BH // batch
    D = w_hdD.shape[-1]
    tm = _pick_tile(S, (512, 256, 128, 64, 32, 16, 8))
    tn = _pick_tile(D, (512, 256, 128))
    grid = (batch, S // tm, D // tn)

    return pl.pallas_call(
        _out_proj_kernel,
        out_shape=jax.ShapeDtypeStruct((batch, S, D), out_dtype),
        grid_spec=pltpu.PrefetchScalarGridSpec(
            num_scalar_prefetch=0,
            grid=grid,
            in_specs=[
                # All h heads of batch b (contiguous rows b*h .. (b+1)*h).
                pl.BlockSpec((h, tm, dk), lambda b_, si, j: (b_, si, 0)),
                pl.BlockSpec((h, dk, tn), lambda b_, si, j: (0, 0, j)),
                pl.BlockSpec((1, tn), lambda b_, si, j: (0, j)),
            ],
            out_specs=pl.BlockSpec((1, tm, tn), lambda b_, si, j: (b_, si, j)),
        ),
        compiler_params=pltpu.CompilerParams(
            dimension_semantics=("parallel", "parallel", "parallel"),
            vmem_limit_bytes=_vmem_limit(),
        ),
    )(x, w_hdD, b)


# ----------------------------------------------------------------------------
# Module wrapper
# ----------------------------------------------------------------------------

class MultiHeadedAttentionPallas:
    def __init__(self, h, d_model, key, dropout=0.1):
        assert d_model % h == 0
        self.h = h
        self.d_k = d_model // h
        self.d_model = d_model

        # 4 x nn.Linear(d_model, d_model), PyTorch default init.
        bound = 1.0 / math.sqrt(d_model)
        keys = jax.random.split(key, 8)
        self.weights = []   # PyTorch layout (Dout, Din), f32 (reference copy)
        self.biases = []
        for i in range(4):
            w = jax.random.uniform(keys[2 * i], (d_model, d_model),
                                   jnp.float32, -bound, bound)
            b = jax.random.uniform(keys[2 * i + 1], (d_model,),
                                   jnp.float32, -bound, bound)
            self.weights.append(w)
            self.biases.append(b)

        scale = 1.0 / math.sqrt(self.d_k)
        wq, wk, wv, wo = self.weights
        bq, bk, bv, bo = self.biases

        # Fold 1/sqrt(d_k) into the Q projection (removes the per-score scale).
        wq_t = wq.T * scale
        bq_s = bq * scale

        # Fused QKV weight (D, 3D): pre-transposed, bf16, built once at init.
        self.w_qkv_t = jnp.concatenate(
            [wq_t, wk.T, wv.T], axis=1).astype(jnp.bfloat16)
        self.b_qkv = jnp.concatenate([bq_s, bk, bv]).reshape(1, 3 * d_model)

        # Separate projections for the cross-attention (distinct inputs) path.
        self.w_q_t = wq_t.astype(jnp.bfloat16)
        self.w_k_t = wk.T.astype(jnp.bfloat16)
        self.w_v_t = wv.T.astype(jnp.bfloat16)
        self.b_q = bq_s.reshape(1, d_model)
        self.b_k = bk.reshape(1, d_model)
        self.b_v = bv.reshape(1, d_model)

        # Output projection stored per-head (H, d_k, D) so the kernel can
        # consume the (B*H, S, d_k) attention output without a transpose.
        self.w_out_hdD = wo.T.reshape(h, self.d_k, d_model).astype(jnp.bfloat16)
        self.b_out = bo.reshape(1, d_model)

    @staticmethod
    def _prepare_mask(mask, B, Sq, Skv):
        """Normalize to ((B,1,Skv) int8, "key") or ((B,Sq,Skv) int8, "full")."""
        if mask is None:
            return None, None
        m = jnp.asarray(mask)
        if m.ndim == 4:          # PyTorch-style [B, 1, Sq, Skv] / [B, 1, 1, Skv]
            m = m.reshape(B, m.shape[-2], m.shape[-1])
        if m.ndim == 2:          # [B, Skv] key-padding mask
            m = m[:, None, :]
        if m.shape[1] == 1:      # key-padding: keep tiny, no S^2 materialization
            return m.astype(jnp.int8), "key"
        return jnp.broadcast_to(m, (B, Sq, Skv)).astype(jnp.int8), "full"

    def __call__(self, query, key, value, mask=None):
        B, Sq, D = query.shape
        Skv = key.shape[1]
        h, d_k = self.h, self.d_k

        if (key is query) and (value is query):
            # Self-attention: one fused QKV matmul (1 launch instead of 3).
            qkv = pallas_linear(query.reshape(B * Sq, D), self.w_qkv_t,
                                self.b_qkv, jnp.bfloat16)          # (B*S, 3D)
            # TODO(synk): this head-split transpose is the one remaining HBM
            #             relayout; folding it into the attention BlockSpecs
            #             needs sub-(8,128) head blocks.
            qkv = qkv.reshape(B, Sq, 3, h, d_k).transpose(2, 0, 3, 1, 4)
            qkv = qkv.reshape(3, B * h, Sq, d_k)
            q, k, v = qkv[0], qkv[1], qkv[2]
        else:
            def project(x, w_t, b):
                Bx, Sx, _ = x.shape
                y = pallas_linear(x.reshape(Bx * Sx, D), w_t, b, jnp.bfloat16)
                return y.reshape(Bx, Sx, h, d_k).transpose(0, 2, 1, 3).reshape(
                    Bx * h, Sx, d_k)
            q = project(query, self.w_q_t, self.b_q)
            k = project(key, self.w_k_t, self.b_k)
            v = project(value, self.w_v_t, self.b_v)

        m, kind = self._prepare_mask(mask, B, Sq, Skv)
        x = pallas_flash_attention(q, k, v, m, kind, h)   # (B*H, Sq, d_k) bf16

        # Head merge + final projection fused: consumes (B*H, Sq, d_k)
        # directly and writes (B, Sq, D) f32 — no post-attention transpose.
        return pallas_out_projection(x, self.w_out_hdD, self.b_out, B,
                                     jnp.float32)


# ----------------------------------------------------------------------------
# Pure-JAX reference (f32) for correctness check
# ----------------------------------------------------------------------------

def reference_forward(mha, query, key, value, mask=None):
    B, S, D = query.shape
    h, d_k = mha.h, mha.d_k

    def lin(x, w, b):
        return x @ w.T + b

    def split(x):
        return x.reshape(B, S, h, d_k).transpose(0, 2, 1, 3)

    q = split(lin(query, mha.weights[0], mha.biases[0]))
    k = split(lin(key, mha.weights[1], mha.biases[1]))
    v = split(lin(value, mha.weights[2], mha.biases[2]))
    scores = jnp.einsum("bhqd,bhkd->bhqk", q, k) / math.sqrt(d_k)
    if mask is not None:
        m = jnp.asarray(mask)
        if m.ndim == 4:
            m = m.reshape(B, m.shape[-2], m.shape[-1])
        if m.ndim == 2:
            m = m[:, None, :]
        m = jnp.broadcast_to(m, (B, S, S))
        scores = jnp.where(m[:, None, :, :] == 0, -1e9, scores)
    p = jax.nn.softmax(scores, axis=-1)
    x = jnp.einsum("bhqk,bhkd->bhqd", p, v)
    x = x.transpose(0, 2, 1, 3).reshape(B, S, h * d_k)
    return lin(x, mha.weights[3], mha.biases[3])


# ----------------------------------------------------------------------------

if __name__ == "__main__":
    B, S, h, d_model = 2, 8, 4, 32
    root = jax.random.PRNGKey(0)
    k_param, k_q, k_k, k_v = jax.random.split(root, 4)

    mha = MultiHeadedAttentionPallas(h, d_model, k_param)

    query = jax.random.normal(k_q, (B, S, d_model), jnp.float32)
    keyx = jax.random.normal(k_k, (B, S, d_model), jnp.float32)
    value = jax.random.normal(k_v, (B, S, d_model), jnp.float32)

    # 1) Cross-attention, no mask (separate-projection path).
    out1 = jax.block_until_ready(mha(query, keyx, value, mask=None))
    ref1 = reference_forward(mha, query, keyx, value, mask=None)
    assert out1.shape == (B, S, d_model)
    assert jnp.allclose(out1, ref1, atol=5e-2, rtol=5e-2), \
        "cross-attention mismatch vs reference"

    # 2) Self-attention with a [B, S] key-padding mask (fused QKV + key-mask).
    key_mask = jnp.ones((B, S), jnp.int32).at[1, S - 2:].set(0)
    out2 = jax.block_until_ready(mha(query, query, query, mask=key_mask))
    ref2 = reference_forward(mha, query, query, query, mask=key_mask)
    assert jnp.allclose(out2, ref2, atol=5e-2, rtol=5e-2), \
        "masked self-attention mismatch vs reference"

    # 3) Self-attention with a PyTorch-style [B, 1, S, S] causal mask (full mask).
    causal = jnp.broadcast_to(jnp.tril(jnp.ones((S, S), jnp.int32)),
                              (B, 1, S, S))
    out3 = jax.block_until_ready(mha(query, query, query, mask=causal))
    ref3 = reference_forward(mha, query, query, query, mask=causal)
    assert jnp.allclose(out3, ref3, atol=5e-2, rtol=5e-2), \
        "causal self-attention mismatch vs reference"

    print("KERNEL_OK")
</pallas_src>

<mosaic_0001>
module attributes {stable_mosaic.version = 11 : i64} {
  func.func @_linear_kernel(%arg0: i32, %arg1: i32, %arg2: i32, %arg3: memref<16x32xf32, #tpu.memory_space<vmem>>, %arg4: memref<32x32xbf16, #tpu.memory_space<vmem>>, %arg5: memref<1x32xf32, #tpu.memory_space<vmem>>, %arg6: memref<16x32xbf16, #tpu.memory_space<vmem>>, %arg7: memref<16x32xf32, #tpu.memory_space<vmem>>) attributes {dimension_semantics = [#tpu.dimension_semantics<parallel>, #tpu.dimension_semantics<parallel>, #tpu.dimension_semantics<arbitrary>], iteration_bounds = array<i64: 1, 1, 1>, scalar_prefetch = 0 : i64, scratch_operands = 1 : i64, tpu.core_type = #tpu.core_type<tc>, window_params = [{transform_indices = @transform_0, window_bounds = array<i64: 16, 32>}, {transform_indices = @transform_1, window_bounds = array<i64: 32, 32>}, {transform_indices = @transform_2, window_bounds = array<i64: 1, 32>}, {transform_indices = @transform_3, window_bounds = array<i64: 16, 32>}]} {
    %c0_i32 = arith.constant 0 : i32
    %0 = arith.cmpi eq, %arg2, %c0_i32 : i32
    %1 = arith.extui %0 : i1 to i32
    %c0_i32_0 = arith.constant 0 : i32
    %2 = arith.cmpi ne, %1, %c0_i32_0 : i32
    scf.if %2 {
      %cst_10 = arith.constant 0.000000e+00 : f32
      %13 = vector.broadcast %cst_10 : f32 to vector<16x32xf32>
      %c0_11 = arith.constant 0 : index
      %c0_12 = arith.constant 0 : index
      %14 = vector.load %arg7[%c0_11, %c0_12] : memref<16x32xf32, #tpu.memory_space<vmem>>, vector<16x32xf32>
      tpu.vector_store %arg7[%c0_11, %c0_12], %13 {strides = array<i32>} : memref<16x32xf32, #tpu.memory_space<vmem>>, vector<16x32xf32>,
    } else {
    }
    %c0 = arith.constant 0 : index
    %c0_1 = arith.constant 0 : index
    %3 = vector.load %arg7[%c0, %c0_1] : memref<16x32xf32, #tpu.memory_space<vmem>>, vector<16x32xf32>
    %c0_2 = arith.constant 0 : index
    %c0_3 = arith.constant 0 : index
    %4 = vector.load %arg3[%c0_2, %c0_3] : memref<16x32xf32, #tpu.memory_space<vmem>>, vector<16x32xf32>
    %5 = arith.truncf %4 : vector<16x32xf32> to vector<16x32xbf16>
    %c0_4 = arith.constant 0 : index
    %c0_5 = arith.constant 0 : index
    %6 = vector.load %arg4[%c0_4, %c0_5] : memref<32x32xbf16, #tpu.memory_space<vmem>>, vector<32x32xbf16>
    %cst = arith.constant dense<0.000000e+00> : vector<16x32xf32>
    %7 = tpu.matmul %5, %6, %cst {dimension_numbers = #tpu.dot_dimension_numbers<[1], [0], [0], [1], [0, 0, 1, 1], [], []>} : vector<16x32xbf16>, vector<32x32xbf16>, vector<16x32xf32> -> vector<16x32xf32>
    %8 = arith.addf %3, %7 : vector<16x32xf32>
    %c0_6 = arith.constant 0 : index
    %c0_7 = arith.constant 0 : index
    %9 = vector.load %arg7[%c0_6, %c0_7] : memref<16x32xf32, #tpu.memory_space<vmem>>, vector<16x32xf32>
    tpu.vector_store %arg7[%c0_6, %c0_7], %8 {strides = array<i32>} : memref<16x32xf32, #tpu.memory_space<vmem>>, vector<16x32xf32>,
    %c0_i32_8 = arith.constant 0 : i32
    %10 = arith.cmpi eq, %arg2, %c0_i32_8 : i32
    %11 = arith.extui %10 : i1 to i32
    %c0_i32_9 = arith.constant 0 : i32
    %12 = arith.cmpi ne, %11, %c0_i32_9 : i32
    scf.if %12 {
      %c0_10 = arith.constant 0 : index
      %c0_11 = arith.constant 0 : index
      %13 = vector.load %arg7[%c0_10, %c0_11] : memref<16x32xf32, #tpu.memory_space<vmem>>, vector<16x32xf32>
      %c0_12 = arith.constant 0 : index
      %c0_13 = arith.constant 0 : index
      %14 = vector.load %arg5[%c0_12, %c0_13] : memref<1x32xf32, #tpu.memory_space<vmem>>, vector<1x32xf32>
      %15 = vector.broadcast %14 : vector<1x32xf32> to vector<16x32xf32>
      %16 = arith.addf %13, %15 : vector<16x32xf32>
      %17 = arith.truncf %16 : vector<16x32xf32> to vector<16x32xbf16>
      %c0_14 = arith.constant 0 : index
      %c0_15 = arith.constant 0 : index
      %18 = vector.load %arg6[%c0_14, %c0_15] : memref<16x32xbf16, #tpu.memory_space<vmem>>, vector<16x32xbf16>
      tpu.vector_store %arg6[%c0_14, %c0_15], %17 {strides = array<i32>} : memref<16x32xbf16, #tpu.memory_space<vmem>>, vector<16x32xbf16>,
    } else {
    }
    return
  }
  func.func @transform_0(%arg0: i32, %arg1: i32, %arg2: i32) -> (i32, i32) {
    %c0_i32 = arith.constant 0 : i32
    return %arg0, %arg2 : i32, i32
  }
  func.func @transform_1(%arg0: i32, %arg1: i32, %arg2: i32) -> (i32, i32) {
    %c0_i32 = arith.constant 0 : i32
    return %arg2, %arg1 : i32, i32
  }
  func.func @transform_2(%arg0: i32, %arg1: i32, %arg2: i32) -> (i32, i32) {
    %c0_i32 = arith.constant 0 : i32
    %c0_i32_0 = arith.constant 0 : i32
    return %c0_i32, %arg1 : i32, i32
  }
  func.func @transform_3(%arg0: i32, %arg1: i32, %arg2: i32) -> (i32, i32) {
    %c0_i32 = arith.constant 0 : i32
    return %arg0, %arg1 : i32, i32
  }
}

</mosaic_0001>

<bundles_post_ra>
// kernel: tpu_custom_call.1
= control target key start
LH: loop header
LB: loop body
LE: loop exit
PB: predicated region body
PF: predicated region fallthrough
CT: control target
= control target key end

     0   :  { %8 = vsyncpa [#allocation4], 0  ;;  %s345_s0 = inlined_call_operand.hbm [shape: f32[16,32], index: 0, kind: input, shape index: {}]   ;;  %s346_s1 = inlined_call_operand.hbm [shape: bf16[32,32], index: 1, kind: input, shape index: {}]   ;;  %s347_s2 = inlined_call_operand.vmem [shape: f32[1,32], index: 2, kind: input, shape index: {}]   ;;  %s348_s3 = inlined_call_operand.hbm [shape: bf16[16,32], index: 3, kind: output, shape index: {}]  }
   0x1   :  { %9 = vsyncpa [#allocation7], 0 }
   0x2   :  { %10 = vsyncpa [#allocation5], 0  ;;  %s266_s12 = smov [#allocation3]   ;;  %s194_s16 = scalar_lea.hbm %s345_s0, 256 }
   0x3   :  { %s16_s13 = sshll.u32 %s266_s12, 4  ;;  %p195_p0 = scmp.ne.s32.totalorder %s345_s0, %s194_s16  ;;  %s17_s13 = int_to_ptr.vmem [resolvable:$true] %s16_s13 }
   0x4   :  { %p198_p1 = scmp.lt.u32.totalorder %s194_s16, %s345_s0 }
   0x6   :  { %p200_p2 = pnand %p198_p1, %p195_p0 }
   0x8   :  { %203 = shalt.err (!%p200_p2)
}
   0x9   :  { %s204_s21 = scalar_lea.vmem %s17_s13, 256  ;;  %p209_p4 = scmp.lt.s32.totalorder %s17_s13, %s17_s13 }
   0xa   :  { %p205_p3 = scmp.ne.s32.totalorder %s17_s13, %s204_s21  ;;  %p210_p5 = scmp.lt.s32.totalorder %s204_s21, %s204_s21 }
   0xc   :  { %p211_p6 = por %p210_p5, %p209_p4 }
   0xe   :  { %p212_p7 = pnand %p211_p6, %p205_p3 }
  0x10   :  { %215 = shalt.err (!%p212_p7)
}
  0x11   :  { %s267_s22 = smov 128   ;;  %s268_s23 = smov 8  }
  0x12   :  { %22 = dma.hbm_to_vmem [thread:$0]  %s345_s0, 256, %s17_s13, [#allocation4], %s267_s22, %s267_s22, %s268_s23  }
  0x13   :  { %s269_s26 = smov [#allocation6]   ;;  %s216_s30 = scalar_lea.hbm %s346_s1, 256 }
  0x14   :  { %s28_s27 = sshll.u32 %s269_s26, 4  ;;  %p217_p8 = scmp.ne.s32.totalorder %s346_s1, %s216_s30  ;;  %s29_s27 = int_to_ptr.vmem [resolvable:$true] %s28_s27 }
  0x15   :  { %p220_p9 = scmp.lt.u32.totalorder %s216_s30, %s346_s1 }
  0x17   :  { %p222_p10 = pnand %p220_p9, %p217_p8 }
  0x19   :  { %225 = shalt.err (!%p222_p10)
}
  0x1a   :  { %s226_s8 = scalar_lea.vmem %s29_s27, 256  ;;  %p231_p12 = scmp.lt.s32.totalorder %s29_s27, %s29_s27 }
  0x1b   :  { %p227_p11 = scmp.ne.s32.totalorder %s29_s27, %s226_s8  ;;  %p232_p13 = scmp.lt.s32.totalorder %s226_s8, %s226_s8 }
  0x1d   :  { %p233_p0 = por %p232_p13, %p231_p12 }
  0x1f   :  { %p234_p1 = pnand %p233_p0, %p227_p11 }
  0x21   :  { %237 = shalt.err (!%p234_p1)
}
  0x22   :  { %s270_s0 = smov 64   ;;  %s271_s9 = smov 4  }
  0x23   :  { %34 = dma.hbm_to_vmem [thread:$0]  %s346_s1, 256, %s29_s27, [#allocation7], %s270_s0, %s270_s0, %s271_s9  }
  0x24   :  { %260 = dma.done.wait [#allocation4], 256  }
  0x25   :  { %261 = vsyncadd [#allocation4], 4294967040 }
  0x26   :  { %262 = dma.done.wait [#allocation7], 256  }
  0x27   :  { %263 = vsyncadd [#allocation7], 4294967040  ;;  %vm48_vm0 = vcmask 261120   ;;  %v272_v0 = vmov 0.0   ;;  %vm273_vm1 = vmmov 0   ;;  %v192_v1 = vld [vmem:[#allocation6] sm:$0xff]  }
  0x28   :  { %175 = vmatprep.subr.bf16.mxu0 %v272_v0  ;;  %179 = vmatprep.mubr.msk.bf16.mxu0 %vm273_vm1, %v272_v0  ;;  %49 = vst.msk [vmem:[#allocation2] sm:$0xff] %vm48_vm0, %v272_v0  ;;  %50 = vst.msk [vmem:[#allocation2 + $0x8] sm:$0xff] %vm48_vm0, %v272_v0  ;;  %v193_v2 = vld [vmem:[#allocation6 + $0x8] sm:$0xff]   ;;  %v53_v3 = vld [vmem:[#allocation3] sm:$0xff]  ;;  %vm143_vm2 = vcmask 257024   ;;  %s274_s13 = smov [#allocation8]  }
  0x29   :  { %176 = vmatpush3.bf16.msra.mxu0 %v192_v1  ;;  %v54_v4 = vld [vmem:[#allocation3 + $0x8] sm:$0xff]  ;;  %v167_v14 = vld [vmem:[%s347_s2] ss:$0 sm:$0xff]  ;;  %s151_s14 = sshll.u32 %s274_s13, 4  ;;  %s152_s14 = int_to_ptr.vmem [resolvable:$true] %s151_s14 }
  0x2a   :  { %177 = vmatprep.subr.bf16.mxu0 %v272_v0  ;;  %v55_v5 = vpack.c.bf16 %v54_v4, %v53_v3  ;;  %s238_s15 = scalar_lea.vmem %s152_s14, 128  ;;  %p243_p3 = scmp.lt.s32.totalorder %s152_s14, %s152_s14 }
  0x2b   :  { %p239_p2 = scmp.ne.s32.totalorder %s152_s14, %s238_s15  ;;  %p244_p4 = scmp.lt.s32.totalorder %s238_s15, %s238_s15 }
  0x2d   :  { %178 = vmatpush3.bf16.msra.mxu0 %v193_v2  ;;  %p245_p5 = por %p244_p4, %p243_p3 }
  0x2f   :  { %v51_v6 = vld [vmem:[#allocation2] sm:$0xff]  ;;  %v52_v8 = vld [vmem:[#allocation2 + $0x8] sm:$0xff]  ;;  %p246_p6 = pnand %p245_p5, %p239_p2 }
  0x30   :  { %180 = vmatmul.mubr.msk.bf16.vlgmr.msra.gmra.mrb[0].mxu0 %vm48_vm0, %v55_v5 }
 0x103   :  { %v110_v7 = vpop.f32.mrb[0].mxu0 }
 0x104   :  { %v117_v9 = vadd.f32 %v110_v7, %v51_v6  ;;  %v181_v10 = vpop.f32.mrb[1].mxu0 }
 0x105   :  { %v113_v11 = vpop.f32.mrb[2].mxu0 }
 0x106   :  { %119 = vst.msk [vmem:[#allocation2] sm:$0xff] %vm48_vm0, %v117_v9  ;;  %v118_v12 = vadd.f32 %v113_v11, %v52_v8  ;;  %v182_v13 = vpop.f32.mrb[3].mxu0 }
 0x108   :  { %120 = vst.msk [vmem:[#allocation2 + $0x8] sm:$0xff] %vm48_vm0, %v118_v12 }
 0x10d   :  { %v124_v15 = vld [vmem:[#allocation2] sm:$0xff] }
 0x10e   :  { %v133_v16 = vadd.f32 %v167_v14, %v124_v15 }
 0x10f   :  { %v125_v17 = vld [vmem:[#allocation2 + $0x8] sm:$0xff] }
 0x110   :  { %v134_v18 = vadd.f32 %v167_v14, %v125_v17  ;;  %v170_v19 = vpack.c.bf16 %v133_v16, %v133_v16 }
 0x112   :  { %v171_v20 = vpack.c.bf16 %v134_v18, %v134_v18  ;;  %144 = vst.msk [vmem:[#allocation8] sm:$0xf] %vm143_vm2, %v170_v19 }
 0x114   :  { %145 = vst.msk [vmem:[#allocation8 + $0x4] sm:$0xf] %vm143_vm2, %v171_v20 }
 0x115   :  { %249 = shalt.err (!%p246_p6)
}
 0x116   :  { %s250_s17 = scalar_lea.hbm %s348_s3, 128 }
 0x117   :  { %p251_p7 = scmp.ne.s32.totalorder %s348_s3, %s250_s17  ;;  %p254_p8 = scmp.lt.u32.totalorder %s250_s17, %s348_s3 }
 0x119   :  { %p256_p9 = pnand %p254_p8, %p251_p7 }
 0x11b   :  { %259 = shalt.err (!%p256_p9)
}
 0x11c   :  { %157 = dma.vmem_to_hbm [thread:$0]  %s152_s14, 128, %s348_s3, [#allocation5], %s270_s0, %s270_s0, %s271_s9  }
 0x11d   :  { %264 = dma.done.wait [#allocation5], 128  }
 0x11e   :  { %265 = vsyncadd [#allocation5], 4294967168 }
 0x11f   :  { %161 = vsyncpa [#allocation4], 1 }
 0x120   :  { %162 = vsyncpa [#allocation7], 1 }
 0x121   :  { %163 = vsyncpa [#allocation5], 1 }

</bundles_post_ra>
